<compile_context>
chip_gen: v5e
topology: v5e:2x2
jax: 0.10.0
libtpu: 0.0.40
codegen_flags: <defaults>
</compile_context>

<pallas_src>
import functools

import jax
import jax.numpy as jnp
from jax.experimental import pallas as pl
from jax.experimental.pallas import tpu as pltpu


# ----------------------------------------------------------------------------
# Pallas kernel: fused SE layer for one batch slab.
# ----------------------------------------------------------------------------
def _se_kernel(x_ref, w1_ref, b1_ref, w2_ref, b2_ref, o_ref, *, inv_hw):
    """x_ref / o_ref: (Bb, C, HWp); w1: (C, Cr); b1: (1, Cr); w2: (Cr, C); b2: (1, C).

    HWp may be zero-padded past the true spatial size, so the global pool is a
    lane-axis sum scaled by 1/HW (padding contributes zero and is sliced outside).
    """
    x = x_ref[...]                                         # (Bb, C, HWp), input dtype

    # --- Squeeze: global average pool over the lane-dense spatial axis. ---
    y = jnp.sum(x.astype(jnp.float32), axis=-1) * inv_hw   # (Bb, C) f32

    # --- Excite: FC -> ReLU -> FC -> sigmoid (tiny, off the bandwidth path). ---
    h = jnp.dot(y, w1_ref[...], preferred_element_type=jnp.float32) + b1_ref[...]
    h = jnp.maximum(h, 0.0)                                # (Bb, Cr)
    s = jnp.dot(h, w2_ref[...], preferred_element_type=jnp.float32) + b2_ref[...]
    s = pl.reciprocal(1.0 + jnp.exp(-s), approx=True)      # sigmoid on EUP, (Bb, C)

    # --- Rescale: broadcast the per-(batch, channel) gate over spatial. ---
    o_ref[...] = (x * s[:, :, None].astype(x.dtype)).astype(o_ref.dtype)


# ----------------------------------------------------------------------------
# Wrapper
# ----------------------------------------------------------------------------
def _choose_batch_block(batch, bytes_per_batch, target_bytes=8 << 20):
    """Pick Bb: slab up to ~8 MiB (safe for v7x 64 MiB VMEM with double-buffered
    in+out), >=2 grid steps when B>=2 (feed both v7x TCs), and Bb | batch."""
    bb = max(1, min(batch, target_bytes // max(bytes_per_batch, 1)))
    if batch >= 2:
        bb = min(bb, max(1, batch // 2))
    while batch % bb:
        bb -= 1
    return bb


def se_layer(x_nchw, w1, b1, w2, b2):
    """Fused SE layer on NCHW input (no layout transposes; spatial dims flattened)."""
    b, c, h, w = x_nchw.shape
    hw = h * w
    cr = w1.shape[1]
    dtype = x_nchw.dtype

    # Lane-dense spatial axis: pad H*W up to a multiple of 128 (no-op when aligned).
    hw_p = ((hw + 127) // 128) * 128
    x3 = x_nchw.reshape(b, c, hw)                          # contiguous, no transpose
    if hw_p != hw:
        x3 = jnp.pad(x3, ((0, 0), (0, 0), (0, hw_p - hw)))

    itemsize = jnp.dtype(dtype).itemsize
    bb = _choose_batch_block(b, c * hw_p * itemsize)
    grid = (b // bb,)

    kernel = functools.partial(_se_kernel, inv_hw=1.0 / float(hw))

    out = pl.pallas_call(
        kernel,
        out_shape=jax.ShapeDtypeStruct((b, c, hw_p), dtype),
        grid=grid,
        in_specs=[
            pl.BlockSpec((bb, c, hw_p), lambda i: (i, 0, 0)),  # activation slab
            pl.BlockSpec((c, cr), lambda i: (0, 0)),           # FC1 weight (C, C/r)
            pl.BlockSpec((1, cr), lambda i: (0, 0)),           # FC1 bias
            pl.BlockSpec((cr, c), lambda i: (0, 0)),           # FC2 weight (C/r, C)
            pl.BlockSpec((1, c), lambda i: (0, 0)),            # FC2 bias
        ],
        out_specs=pl.BlockSpec((bb, c, hw_p), lambda i: (i, 0, 0)),
        compiler_params=pltpu.CompilerParams(
            dimension_semantics=("parallel",),        # batch slabs split across TCs
            vmem_limit_bytes=48 * 1024 * 1024,        # 4x slab + weights fit v7x 64 MiB
        ),
    )(x3,
      w1.astype(jnp.float32), b1.astype(jnp.float32),
      w2.astype(jnp.float32), b2.astype(jnp.float32))

    if hw_p != hw:
        out = out[:, :, :hw]
    return out.reshape(b, c, h, w)


def init_params(key, channel, reduction=16):
    """torch nn.Linear default init: U(-1/sqrt(fan_in), 1/sqrt(fan_in)) for W and b."""
    cr = channel // reduction
    k1, k2, k3, k4 = jax.random.split(key, 4)
    bound1 = 1.0 / (channel ** 0.5)
    w1 = jax.random.uniform(k1, (channel, cr), jnp.float32, -bound1, bound1)  # (in, out)
    b1 = jax.random.uniform(k2, (1, cr), jnp.float32, -bound1, bound1)
    bound2 = 1.0 / (cr ** 0.5)
    w2 = jax.random.uniform(k3, (cr, channel), jnp.float32, -bound2, bound2)
    b2 = jax.random.uniform(k4, (1, channel), jnp.float32, -bound2, bound2)
    return w1, b1, w2, b2


# ----------------------------------------------------------------------------
if __name__ == "__main__":
    key = jax.random.PRNGKey(0)
    kx, kp = jax.random.split(key)

    # channel=64, reduction=16 -> squeeze dim 4 (typical SELayer usage in this model).
    B, C, H, W = 2, 64, 16, 16
    x = jax.random.normal(kx, (B, C, H, W), jnp.float32)
    w1, b1, w2, b2 = init_params(kp, C, reduction=16)

    fwd = jax.jit(se_layer)
    out = jax.block_until_ready(fwd(x, w1, b1, w2, b2))
    assert out.shape == (B, C, H, W), out.shape
    assert out.dtype == x.dtype, out.dtype

    # Pure-JAX reference check of the forward-pass semantics.
    y_ref = x.mean(axis=(2, 3))                                # (B, C)
    h_ref = jnp.maximum(y_ref @ w1 + b1, 0.0)
    s_ref = 1.0 / (1.0 + jnp.exp(-(h_ref @ w2 + b2)))
    ref = x * s_ref[:, :, None, None]
    err = float(jnp.max(jnp.abs(out - ref)))
    assert jnp.allclose(out, ref, rtol=5e-3, atol=5e-3), err

    print("KERNEL_OK")
</pallas_src>

<mosaic_0001>
module attributes {stable_mosaic.version = 11 : i64} {
  func.func @_se_kernel(%arg0: i32, %arg1: memref<1x64x256xf32, #tpu.memory_space<vmem>>, %arg2: memref<64x4xf32, #tpu.memory_space<vmem>>, %arg3: memref<1x4xf32, #tpu.memory_space<vmem>>, %arg4: memref<4x64xf32, #tpu.memory_space<vmem>>, %arg5: memref<1x64xf32, #tpu.memory_space<vmem>>, %arg6: memref<1x64x256xf32, #tpu.memory_space<vmem>>) attributes {dimension_semantics = [#tpu.dimension_semantics<parallel>], iteration_bounds = array<i64: 2>, scalar_prefetch = 0 : i64, scratch_operands = 0 : i64, tpu.core_type = #tpu.core_type<tc>, window_params = [{transform_indices = @transform_0, window_bounds = array<i64: 1, 64, 256>}, {pipeline_mode = #tpu.pipeline_mode<synchronous>, transform_indices = @transform_1, window_bounds = array<i64: 64, 4>}, {pipeline_mode = #tpu.pipeline_mode<synchronous>, transform_indices = @transform_2, window_bounds = array<i64: 1, 4>}, {pipeline_mode = #tpu.pipeline_mode<synchronous>, transform_indices = @transform_3, window_bounds = array<i64: 4, 64>}, {pipeline_mode = #tpu.pipeline_mode<synchronous>, transform_indices = @transform_4, window_bounds = array<i64: 1, 64>}, {transform_indices = @transform_5, window_bounds = array<i64: 1, 64, 256>}]} {
    %c0 = arith.constant 0 : index
    %c0_0 = arith.constant 0 : index
    %c0_1 = arith.constant 0 : index
    %0 = vector.load %arg1[%c0, %c0_0, %c0_1] : memref<1x64x256xf32, #tpu.memory_space<vmem>>, vector<1x64x256xf32>
    %cst = arith.constant dense<0.000000e+00> : vector<1x64xf32>
    %1 = vector.multi_reduction <add>, %0, %cst [2] : vector<1x64x256xf32> to vector<1x64xf32>
    %cst_2 = arith.constant 3.906250e-03 : f32
    %2 = vector.broadcast %cst_2 : f32 to vector<1x64xf32>
    %3 = arith.mulf %1, %2 : vector<1x64xf32>
    %c0_3 = arith.constant 0 : index
    %c0_4 = arith.constant 0 : index
    %4 = vector.load %arg2[%c0_3, %c0_4] : memref<64x4xf32, #tpu.memory_space<vmem>>, vector<64x4xf32>
    %cst_5 = arith.constant dense<0.000000e+00> : vector<1x4xf32>
    %5 = tpu.matmul %3, %4, %cst_5 {dimension_numbers = #tpu.dot_dimension_numbers<[1], [0], [0], [1], [0, 0, 1, 1], [], []>} : vector<1x64xf32>, vector<64x4xf32>, vector<1x4xf32> -> vector<1x4xf32>
    %c0_6 = arith.constant 0 : index
    %c0_7 = arith.constant 0 : index
    %6 = vector.load %arg3[%c0_6, %c0_7] : memref<1x4xf32, #tpu.memory_space<vmem>>, vector<1x4xf32>
    %7 = arith.addf %5, %6 : vector<1x4xf32>
    %cst_8 = arith.constant 0.000000e+00 : f32
    %8 = vector.broadcast %cst_8 : f32 to vector<1x4xf32>
    %9 = arith.maximumf %7, %8 : vector<1x4xf32>
    %c0_9 = arith.constant 0 : index
    %c0_10 = arith.constant 0 : index
    %10 = vector.load %arg4[%c0_9, %c0_10] : memref<4x64xf32, #tpu.memory_space<vmem>>, vector<4x64xf32>
    %cst_11 = arith.constant dense<0.000000e+00> : vector<1x64xf32>
    %11 = tpu.matmul %9, %10, %cst_11 {dimension_numbers = #tpu.dot_dimension_numbers<[1], [0], [0], [1], [0, 0, 1, 1], [], []>} : vector<1x4xf32>, vector<4x64xf32>, vector<1x64xf32> -> vector<1x64xf32>
    %c0_12 = arith.constant 0 : index
    %c0_13 = arith.constant 0 : index
    %12 = vector.load %arg5[%c0_12, %c0_13] : memref<1x64xf32, #tpu.memory_space<vmem>>, vector<1x64xf32>
    %13 = arith.addf %11, %12 : vector<1x64xf32>
    %cst_14 = arith.constant 0.000000e+00 : f32
    %14 = vector.broadcast %cst_14 : f32 to vector<1x64xf32>
    %15 = arith.subf %14, %13 : vector<1x64xf32>
    %16 = math.exp %15 : vector<1x64xf32>
    %cst_15 = arith.constant 1.000000e+00 : f32
    %17 = vector.broadcast %cst_15 : f32 to vector<1x64xf32>
    %18 = arith.addf %17, %16 : vector<1x64xf32>
    %19 = tpu.reciprocal %18 {approx = true} : vector<1x64xf32> -> vector<1x64xf32>
    %20 = vector.shape_cast %19 : vector<1x64xf32> to vector<1x64x1xf32>
    %21 = vector.broadcast %20 : vector<1x64x1xf32> to vector<1x64x256xf32>
    %22 = arith.mulf %0, %21 : vector<1x64x256xf32>
    %c0_16 = arith.constant 0 : index
    %c0_17 = arith.constant 0 : index
    %c0_18 = arith.constant 0 : index
    %23 = vector.load %arg6[%c0_16, %c0_17, %c0_18] : memref<1x64x256xf32, #tpu.memory_space<vmem>>, vector<1x64x256xf32>
    tpu.vector_store %arg6[%c0_16, %c0_17, %c0_18], %22 {strides = array<i32>} : memref<1x64x256xf32, #tpu.memory_space<vmem>>, vector<1x64x256xf32>,
    return
  }
  func.func @transform_0(%arg0: i32) -> (i32, i32, i32) {
    %c0_i32 = arith.constant 0 : i32
    %c0_i32_0 = arith.constant 0 : i32
    %c0_i32_1 = arith.constant 0 : i32
    return %arg0, %c0_i32, %c0_i32_0 : i32, i32, i32
  }
  func.func @transform_1(%arg0: i32) -> (i32, i32) {
    %c0_i32 = arith.constant 0 : i32
    %c0_i32_0 = arith.constant 0 : i32
    %c0_i32_1 = arith.constant 0 : i32
    return %c0_i32, %c0_i32_0 : i32, i32
  }
  func.func @transform_2(%arg0: i32) -> (i32, i32) {
    %c0_i32 = arith.constant 0 : i32
    %c0_i32_0 = arith.constant 0 : i32
    %c0_i32_1 = arith.constant 0 : i32
    return %c0_i32, %c0_i32_0 : i32, i32
  }
  func.func @transform_3(%arg0: i32) -> (i32, i32) {
    %c0_i32 = arith.constant 0 : i32
    %c0_i32_0 = arith.constant 0 : i32
    %c0_i32_1 = arith.constant 0 : i32
    return %c0_i32, %c0_i32_0 : i32, i32
  }
  func.func @transform_4(%arg0: i32) -> (i32, i32) {
    %c0_i32 = arith.constant 0 : i32
    %c0_i32_0 = arith.constant 0 : i32
    %c0_i32_1 = arith.constant 0 : i32
    return %c0_i32, %c0_i32_0 : i32, i32
  }
  func.func @transform_5(%arg0: i32) -> (i32, i32, i32) {
    %c0_i32 = arith.constant 0 : i32
    %c0_i32_0 = arith.constant 0 : i32
    %c0_i32_1 = arith.constant 0 : i32
    return %arg0, %c0_i32, %c0_i32_0 : i32, i32, i32
  }
}

</mosaic_0001>

<bundles_post_ra>
// kernel: se_layer.1
= control target key start
LH: loop header
LB: loop body
LE: loop exit
PB: predicated region body
PF: predicated region fallthrough
CT: control target
= control target key end

     0   :  { %s591_s18 = smov 0   ;;  %s730_s0 = inlined_call_operand.vmem [shape: f32[2,64,256], index: 0, kind: input, shape index: {}]   ;;  %s731_s1 = inlined_call_operand.vmem [shape: f32[64,4], index: 1, kind: input, shape index: {}]   ;;  %s732_s2 = inlined_call_operand.vmem [shape: f32[1,4], index: 2, kind: input, shape index: {}]   ;;  %s733_s3 = inlined_call_operand.vmem [shape: f32[4,64], index: 3, kind: input, shape index: {}]   ;;  %s734_s4 = inlined_call_operand.vmem [shape: f32[1,64], index: 4, kind: input, shape index: {}]   ;;  %s735_s5 = inlined_call_operand.vmem [shape: f32[2,64,256], index: 5, kind: output, shape index: {}]  }
   0x1 LB: > { %s516_s19 = sadd.s32 4294967295, %s559_s18   ;;  %p520_p0 = scmp.ge.s32.totalorder %s559_s18, 1  ;;  %s559_s18 = sphi %s591_s18, %s15_s18  }
   0x2   : > { %p187_p1 = scmp.lt.s32.totalorder %s559_s18, 3 }
   0x4   : > { %p188_p2 = pnand %p520_p0, %p187_p1 }
   0x5   : > { %p215_p3 = scmp.lt.s32.totalorder (!%p188_p2), %s516_s19, 1 }
   0x6   : > { %191 = sbr.rel (%p188_p2) target bundleno = 586 (0x24a), region = 40 }
   0xb   : > { %s737_s19 = smov (!%p215_p3, %s516_s19), 1  ;;  %v280_v24 = vld [vmem:[%s731_s1 + $0x38] sm:$0xff]  ;;  %v279_v25 = vld [vmem:[%s731_s1 + $0x30] sm:$0xff]  ;;  %v278_v26 = vld [vmem:[%s731_s1 + $0x28] sm:$0xff]  ;;  %v290_v32 = vlaneseq  ;;  %vm295_vm0 = vcmask 130112   ;;  %vm299_vm1 = vcmask 195712  }
   0xc   : > { %s530_s20 = sshll.u32 %s737_s19, 7  ;;  %332 = vmatpush.msra.mxu0 %v280_v24  ;;  %v277_v27 = vld [vmem:[%s731_s1 + $0x20] sm:$0xff]  ;;  %v276_v28 = vld [vmem:[%s731_s1 + $0x18] sm:$0xff]  ;;  %v275_v29 = vld [vmem:[%s731_s1 + $0x10] sm:$0xff]  ;;  %vm303_vm2 = vcmask 261312   ;;  %vm307_vm3 = vcmask 326912  }
   0xd   : > { %s219_s23 = scalar_lea.vmem %s730_s0, %s530_s20  ;;  %v274_v30 = vld [vmem:[%s731_s1 + $0x8] sm:$0xff]  ;;  %v273_v31 = vld [vmem:[%s731_s1] sm:$0xff]  ;;  %v291_v36 = vand.u32 127, %v290_v32  ;;  %vm311_vm4 = vcmask 392512   ;;  %vm315_vm5 = vcmask 458112   ;;  %vm319_vm6 = vcmask 523712   ;;  %s693_s26 = scalar_lea.vmem %s735_s5, %s530_s20 }
   0xe   : > { %v607_v0 = vld [vmem:[%s219_s23] sm:$0xff]  ;;  %v609_v1 = vld [vmem:[%s219_s23 + $0x8] sm:$0xff]  ;;  %v625_v9 = vld [vmem:[%s219_s23 + $0x10] sm:$0xff]  ;;  %333 = vmatpush.msra.mxu0 %v279_v25  ;;  %vm321_vm7 = vcmask 523264   ;;  %vm351_vm8 = vcmask 1043456   ;;  %vm347_vm9 = vcmask 31744  }
   0xf   : > { %v611_v2 = vld [vmem:[%s219_s23 + $0x20] sm:$0xff]  ;;  %v241_v3 = vadd.f32 %v609_v1, %v607_v0  ;;  %v615_v4 = vld [vmem:[%s219_s23 + $0x28] sm:$0xff]  ;;  %v627_v10 = vld [vmem:[%s219_s23 + $0x18] sm:$0xff]  ;;  %v293_v38 = vadd.s32 4294967288, %v291_v36  ;;  %v297_v39 = vadd.s32 4294967280, %v291_v36  ;;  %v301_v42 = vadd.s32 4294967272, %v291_v36 }
  0x10   : > { %v617_v5 = vld [vmem:[%s219_s23 + $0x40] sm:$0xff]  ;;  %v619_v6 = vld [vmem:[%s219_s23 + $0x48] sm:$0xff]  ;;  %v247_v7 = vadd.f32 %v615_v4, %v611_v2  ;;  %v629_v11 = vld [vmem:[%s219_s23 + $0x30] sm:$0xff]  ;;  %v244_v15 = vadd.f32 %v627_v10, %v625_v9  ;;  %334 = vmatpush.msra.mxu0 %v278_v26  ;;  %v305_v46 = vadd.s32 4294967264, %v291_v36  ;;  %v309_v53 = vadd.s32 4294967256, %v291_v36 }
  0x11   : > { %v253_v8 = vadd.f32 %v619_v6, %v617_v5  ;;  %242 = vadd.xlane.f32.xlu0 %v241_v3  ;;  %v631_v12 = vld [vmem:[%s219_s23 + $0x38] sm:$0xff]  ;;  %v633_v13 = vld [vmem:[%s219_s23 + $0x50] sm:$0xff]  ;;  %v643_v18 = vld [vmem:[%s219_s23 + $0x60] sm:$0xff]  ;;  %v313_v59 = vadd.s32 4294967248, %v291_v36  ;;  %v317_v62 = vadd.s32 4294967240, %v291_v36 }
  0x12   : > { %248 = vadd.xlane.f32.xlu1 %v247_v7  ;;  %v635_v14 = vld [vmem:[%s219_s23 + $0x58] sm:$0xff]  ;;  %v250_v16 = vadd.f32 %v631_v12, %v629_v11  ;;  %v645_v19 = vld [vmem:[%s219_s23 + $0x68] sm:$0xff]  ;;  %v647_v20 = vld [vmem:[%s219_s23 + $0x70] sm:$0xff]  ;;  %335 = vmatpush.msra.mxu0 %v277_v27 }
  0x13   : > { %254 = vadd.xlane.f32.xlu2 %v253_v8  ;;  %v256_v17 = vadd.f32 %v635_v14, %v633_v13  ;;  %v649_v21 = vld [vmem:[%s219_s23 + $0x78] sm:$0xff]  ;;  %v259_v22 = vadd.f32 %v645_v19, %v643_v18  ;;  %v345_v24 = vld [vmem:[%s733_s3] sm:$0xf] }
  0x14   : > { %v262_v23 = vadd.f32 %v649_v21, %v647_v20  ;;  %336 = vmatpush.msra.mxu0 %v276_v28  ;;  %526 = vmatpush.msk.msra.mxu1 %vm351_vm8, %v345_v24  ;;  %v281_v25 = vld [vmem:[%s732_s2] sm:$0x1] }
  0x16   : > { %337 = vmatpush.msra.mxu0 %v275_v29  ;;  %v382_v29 = vshrl.u32 %v290_v32, 7 }
  0x18   : > { %338 = vmatpush.msra.mxu0 %v274_v30  ;;  %540 = vset.pattern.permute.xlu2 %v382_v29  ;;  %v395_v30 = vadd.s32 16, %v382_v29  ;;  %v413_v32 = vadd.s32 40, %v382_v29 }
  0x19   : > { %245 = vadd.xlane.f32.xlu0 %v244_v15 }
  0x1a   : > { %251 = vadd.xlane.f32.xlu1 %v250_v16  ;;  %339 = vmatpush.msra.mxu0 %v273_v31  ;;  %v389_v31 = vadd.s32 8, %v382_v29 }
  0x1b   : > { %257 = vadd.xlane.f32.xlu2 %v256_v17  ;;  %542 = vset.pattern.permute.xlu1 %v395_v30 }
  0x1c   : > { %541 = vset.pattern.permute.xlu0 %v389_v31 }
  0x21   : > { %260 = vadd.xlane.f32.xlu0 %v259_v22 }
  0x22   : > { %263 = vadd.xlane.f32.xlu1 %v262_v23 }
  0x84   : > { %v243_v33 = vpop.xlane.xlu0 %242 }
  0x85   : > { %v249_v34 = vpop.xlane.xlu1 %248  ;;  %v265_v37 = vmul.f32 0.00390625, %v243_v33  ;;  %v346_v33 = vld [vmem:[%s734_s4] sm:$0x1] }
  0x86   : > { %v255_v35 = vpop.xlane.xlu2 %254  ;;  %v267_v40 = vmul.f32 0.00390625, %v249_v34 }
  0x87   : > { %v292_v48 = vperm.slane %v265_v37, %v291_v36  ;;  %v269_v49 = vmul.f32 0.00390625, %v255_v35 }
  0x88   : > { %v298_v51 = vperm.slane %v267_v40, %v297_v39 }
  0x89   : > { %v306_v57 = vperm.slane %v269_v49, %v305_v46 }
  0x8c   : > { %v246_v41 = vpop.xlane.xlu0 %245 }
  0x8d   : > { %v266_v43 = vmul.f32 0.00390625, %v246_v41  ;;  %v252_v44 = vpop.xlane.xlu1 %251 }
  0x8e   : > { %v258_v45 = vpop.xlane.xlu2 %257  ;;  %v268_v47 = vmul.f32 0.00390625, %v252_v44  ;;  %v407_v44 = vadd.s32 32, %v382_v29 }
  0x8f   : > { %v294_v50 = vperm.slane %v266_v43, %v293_v38  ;;  %v270_v54 = vmul.f32 0.00390625, %v258_v45  ;;  %v425_v43 = vadd.s32 56, %v382_v29  ;;  %v419_v45 = vadd.s32 48, %v382_v29 }
  0x90   : > { %v302_v52 = vperm.slane %v268_v47, %v301_v42  ;;  %v401_v42 = vadd.s32 24, %v382_v29 }
  0x91   : > { %v296_v55 = vsel %vm295_vm0, %v294_v50, %v292_v48  ;;  %v310_v60 = vperm.slane %v270_v54, %v309_v53 }
  0x92   : > { %v300_v56 = vsel %vm299_vm1, %v298_v51, %v296_v55 }
  0x93   : > { %v304_v58 = vsel %vm303_vm2, %v302_v52, %v300_v56 }
  0x94   : > { %v261_v61 = vpop.xlane.xlu0 %260  ;;  %v308_v7 = vsel %vm307_vm3, %v306_v57, %v304_v58 }
  0x95   : > { %v271_v63 = vmul.f32 0.00390625, %v261_v61  ;;  %v264_v3 = vpop.xlane.xlu1 %263  ;;  %v312_v17 = vsel %vm311_vm4, %v310_v60, %v308_v7 }
  0x96   : > { %v272_v8 = vmul.f32 0.00390625, %v264_v3 }
  0x97   : > { %v314_v15 = vperm.slane %v271_v63, %v313_v59 }
  0x98   : > { %v318_v16 = vperm.slane %v272_v8, %v317_v62 }
  0x99   : > { %v316_v22 = vsel %vm315_vm5, %v314_v15, %v312_v17 }
  0x9a   : > { %v320_v23 = vsel %vm319_vm6, %v318_v16, %v316_v22 }
  0x9b   : > { %525 = vmatmul.msk.f32.vlgmr.msra.gmra.mxu0 %vm321_vm7, %v320_v23 }
 0x118   : > { %v341_v26 = vpop.f32.mrf.mxu0 }
 0x119   : > { %v342_v27 = vadd.f32 %v341_v26, %v281_v25 }
 0x11b   : > { %v344_v28 = vmax.f32 %v342_v27, 0.0 }
 0x11d   : > { %527 = vmatmul.msk.f32.vlgmr.msra.gmra.mxu1 %vm347_vm9, %v344_v28 }
 0x19a   : > { %v372_v34 = vpop.f32.mrf.mxu1 }
 0x19b   : > { %v373_v35 = vadd.f32 %v372_v34, %v346_v33 }
 0x19d   : > { %v375_v36 = vsub.f32 0.0, %v373_v35 }
 0x19f   : > { %v376_v37 = vmul.f32 1.442695, %v375_v36 }
 0x1a1   : > { %549 = vpow2.f32 %v376_v37 }
 0x1a7   : > { %v550_v38 = vpop.eup %549 }
 0x1a8   : > { %v378_v39 = vadd.f32 1.0, %v550_v38 }
 0x1aa   : > { %551 = vrcp.f32 %v378_v39 }
 0x1b0   : > { %v552_v40 = vpop.eup %551 }
 0x1b1   : > { %v380_v41 = vperm.slane %v552_v40, 0 }
 0x1b3   : > { %397 = vperm.xlu1 %542, %v380_v41   ;;  %391 = vperm.xlu0 %541, %v380_v41  }
 0x1b4   : > { %385 = vperm.xlu2 %540, %v380_v41  }
 0x1bb   : > { %545 = vset.pattern.permute.xlu1 %v413_v32  ;;  %548 = vset.pattern.permute.xlu0 %v425_v43 }
 0x1bc   : > { %543 = vset.pattern.permute.xlu2 %v401_v42 }
 0x1c3   : > { %415 = vperm.xlu1 %545, %v380_v41  }
 0x1c4   : > { %403 = vperm.xlu2 %543, %v380_v41  }
 0x1cb   : > { %547 = vset.pattern.permute.xlu1 %v425_v43 }
 0x1cc   : > { %544 = vset.pattern.permute.xlu2 %v407_v44 }
 0x1d3   : > { %427 = vperm.xlu1 %547, %v380_v41  }
 0x1d4   : > { %409 = vperm.xlu2 %544, %v380_v41  }
 0x1dc   : > { %546 = vset.pattern.permute.xlu2 %v419_v45 }
 0x1e4   : > { %421 = vperm.xlu2 %546, %v380_v41  }
 0x20e   : > { %v386_v46 = vpop.permute.xlu2 %385 }
 0x20f   : > { %v429_v47 = vmul.f32 %v386_v46, %v607_v0  ;;  %v430_v48 = vmul.f32 %v386_v46, %v609_v1 }
 0x211   : > { %445 = vst [vmem:[%s693_s26] sm:$0xff] %v429_v47 }
 0x212   : > { %446 = vst [vmem:[%s693_s26 + $0x8] sm:$0xff] %v430_v48 }
 0x21e   : > { %v404_v49 = vpop.permute.xlu2 %403 }
 0x21f   : > { %v435_v50 = vmul.f32 %v404_v49, %v629_v11  ;;  %v436_v51 = vmul.f32 %v404_v49, %v631_v12 }
 0x221   : > { %451 = vst [vmem:[%s693_s26 + $0x30] sm:$0xff] %v435_v50 }
 0x222   : > { %452 = vst [vmem:[%s693_s26 + $0x38] sm:$0xff] %v436_v51 }
 0x225   : > { %v398_v52 = vpop.permute.xlu1 %397  ;;  %v392_v53 = vpop.permute.xlu0 %391 }
 0x226   : > { %v433_v0 = vmul.f32 %v398_v52, %v611_v2  ;;  %v434_v1 = vmul.f32 %v398_v52, %v615_v4  ;;  %v431_v54 = vmul.f32 %v392_v53, %v625_v9  ;;  %v432_v55 = vmul.f32 %v392_v53, %v627_v10 }
 0x228   : > { %449 = vst [vmem:[%s693_s26 + $0x20] sm:$0xff] %v433_v0 }
 0x229   : > { %450 = vst [vmem:[%s693_s26 + $0x28] sm:$0xff] %v434_v1 }
 0x22a   : > { %447 = vst [vmem:[%s693_s26 + $0x10] sm:$0xff] %v431_v54 }
 0x22b   : > { %448 = vst [vmem:[%s693_s26 + $0x18] sm:$0xff] %v432_v55 }
 0x22e   : > { %v410_v11 = vpop.permute.xlu2 %409 }
 0x22f   : > { %v437_v12 = vmul.f32 %v410_v11, %v617_v5  ;;  %v438_v56 = vmul.f32 %v410_v11, %v619_v6 }
 0x231   : > { %453 = vst [vmem:[%s693_s26 + $0x40] sm:$0xff] %v437_v12 }
 0x232   : > { %454 = vst [vmem:[%s693_s26 + $0x48] sm:$0xff] %v438_v56 }
 0x235   : > { %v416_v2 = vpop.permute.xlu1 %415 }
 0x236   : > { %v439_v4 = vmul.f32 %v416_v2, %v633_v13  ;;  %v440_v9 = vmul.f32 %v416_v2, %v635_v14 }
 0x238   : > { %455 = vst [vmem:[%s693_s26 + $0x50] sm:$0xff] %v439_v4 }
 0x239   : > { %456 = vst [vmem:[%s693_s26 + $0x58] sm:$0xff] %v440_v9 }
 0x23e   : > { %v422_v10 = vpop.permute.xlu2 %421 }
 0x23f   : > { %v441_v57 = vmul.f32 %v422_v10, %v643_v18  ;;  %v442_v58 = vmul.f32 %v422_v10, %v645_v19 }
 0x241   : > { %457 = vst [vmem:[%s693_s26 + $0x60] sm:$0xff] %v441_v57 }
 0x242   : > { %458 = vst [vmem:[%s693_s26 + $0x68] sm:$0xff] %v442_v58 }
 0x245   : > { %v428_v5 = vpop.permute.xlu1 %427 }
 0x246   : > { %v443_v6 = vmul.f32 %v428_v5, %v647_v20  ;;  %v444_v59 = vmul.f32 %v428_v5, %v649_v21 }
 0x248   : > { %459 = vst [vmem:[%s693_s26 + $0x70] sm:$0xff] %v443_v6 }
 0x249   : > { %460 = vst [vmem:[%s693_s26 + $0x78] sm:$0xff] %v444_v59 }
 0x24a PF: > { %s15_s18 = sadd.s32 1, %s559_s18  }
 0x24b   : > { %p12_p4 = scmp.ge.s32.totalorder %s15_s18, 4  }
 0x24d   :  { %14 = sbr.rel (!%p12_p4) target bundleno = 1 (0x1), region = 70 }

</bundles_post_ra>
